<compile_context>
chip_gen: v5e
topology: v5e:2x2
jax: 0.10.0
libtpu: 0.0.40
codegen_flags: <defaults>
</compile_context>

<pallas_src>
import jax
import jax.numpy as jnp
from jax.experimental import pallas as pl
from jax.experimental.pallas import tpu as pltpu


def _round_up(x: int, m: int) -> int:
    return (x + m - 1) // m * m


def _offset_add_kernel(vert_ref, off_ref, out_ref):
    # vert_ref: (1, TF) tile, off_ref/out_ref: (TN, TF) tiles, all in VMEM.
    # Broadcast add along the batch (sublane) axis; compute in f32 vregs.
    v = vert_ref[...].astype(jnp.float32)
    o = off_ref[...].astype(jnp.float32)
    out_ref[...] = (o + v).astype(out_ref.dtype)


def tshirt_offsetter(
    vertices: jax.Array,
    offset: jax.Array,
    *,
    use_pallas: bool | None = None,
    donate_offset: bool = False,
) -> jax.Array:
    """vertices: (V, 3), offset: (n, 3*V) -> (n, V, 3) = vertices + offset.view(n, V, 3)."""
    V, three = vertices.shape
    assert three == 3
    n, flat = offset.shape
    assert flat == 3 * V
    dtype = offset.dtype
    itemsize = jnp.dtype(dtype).itemsize

    # For tiny problems a standalone kernel is pure launch/DMA overhead; let
    # XLA fuse the add instead (auto dispatch unless the caller forces it).
    if use_pallas is None:
        use_pallas = (n * flat + flat) * itemsize >= (1 << 20)
    if not use_pallas:
        return vertices[None, :, :].astype(dtype) + offset.reshape(n, V, 3)

    vert_flat = vertices.reshape(1, flat).astype(dtype)  # (1, 3V), lane-dense

    # Lane tile: multiple of 128, capped at 1024.
    TF = min(1024, _round_up(flat, 128))
    pf = _round_up(flat, TF)

    # Sublane tile: if n is small / already aligned enough, use the full batch
    # (block dim equal to the array dim is always legal) and skip padding;
    # otherwise pick an 8-aligned tile up to 256 rows.
    if n <= 256 and (n < 8 or n % 8 == 0):
        TN = n
        pn = n
    else:
        TN = min(256, _round_up(n, 8))
        pn = _round_up(n, TN)

    off_p = offset
    vert_p = vert_flat
    if pf != flat:
        off_p = jnp.pad(off_p, ((0, 0), (0, pf - flat)))
        vert_p = jnp.pad(vert_p, ((0, 0), (0, pf - flat)))
    if pn != n:
        off_p = jnp.pad(off_p, ((0, pn - n), (0, 0)))

    # Grid: flat axis outer, n axis inner (fastest) -> vertices block index is
    # constant across consecutive steps, so its (1, TF) tile is not re-fetched
    # per batch block.
    grid = (pf // TF, pn // TN)

    extra_kwargs = {}
    if donate_offset:
        # Reuse the offset HBM buffer for the output (operand 1 -> output 0).
        extra_kwargs["input_output_aliases"] = {1: 0}

    out_p = pl.pallas_call(
        _offset_add_kernel,
        out_shape=jax.ShapeDtypeStruct((pn, pf), dtype),
        grid=grid,
        in_specs=[
            pl.BlockSpec((1, TF), lambda j, i: (0, j)),   # vertices (resident over n)
            pl.BlockSpec((TN, TF), lambda j, i: (i, j)),  # offset
        ],
        out_specs=pl.BlockSpec((TN, TF), lambda j, i: (i, j)),
        compiler_params=pltpu.CompilerParams(
            dimension_semantics=("parallel", "parallel"),
        ),
        cost_estimate=pl.CostEstimate(
            flops=pn * pf,
            transcendentals=0,
            bytes_accessed=(2 * pn * pf + pf) * itemsize,
        ),
        **extra_kwargs,
    )(vert_p, off_p)

    if pn != n or pf != flat:
        out_p = out_p[:n, :flat]
    return out_p.reshape(n, V, 3)


if __name__ == "__main__":
    key = jax.random.PRNGKey(0)
    k_vert, k_off = jax.random.split(key)

    n = 2          # batch of offsets
    V = 128        # number of mesh vertices
    flat = 3 * V   # flattened offset dim (= 384, already a multiple of 128)

    vertices = jax.random.normal(k_vert, (V, 3), dtype=jnp.float32)
    offset = jax.random.normal(k_off, (n, flat), dtype=jnp.float32)

    # Force the Pallas path so the kernel itself is exercised at this toy size.
    out = tshirt_offsetter(vertices, offset, use_pallas=True)
    out = jax.block_until_ready(out)

    # Reference check (plain JAX, mirrors the PyTorch forward exactly).
    ref = vertices[None, :, :] + offset.reshape(n, V, 3)
    assert out.shape == (n, V, 3)
    assert jnp.allclose(out, ref, atol=1e-6, rtol=1e-6)

    print("KERNEL_OK")
</pallas_src>

<mosaic_0001>
module attributes {stable_mosaic.version = 11 : i64} {
  func.func @_offset_add_kernel(%arg0: i32, %arg1: i32, %arg2: memref<1x384xf32, #tpu.memory_space<vmem>>, %arg3: memref<2x384xf32, #tpu.memory_space<vmem>>, %arg4: memref<2x384xf32, #tpu.memory_space<vmem>>) attributes {dimension_semantics = [#tpu.dimension_semantics<parallel>, #tpu.dimension_semantics<parallel>], iteration_bounds = array<i64: 1, 1>, scalar_prefetch = 0 : i64, scratch_operands = 0 : i64, tpu.core_type = #tpu.core_type<tc>, window_params = [{transform_indices = @transform_0, window_bounds = array<i64: 1, 384>}, {transform_indices = @transform_1, window_bounds = array<i64: 2, 384>}, {transform_indices = @transform_2, window_bounds = array<i64: 2, 384>}]} {
    %c0 = arith.constant 0 : index
    %c0_0 = arith.constant 0 : index
    %0 = vector.load %arg2[%c0, %c0_0] : memref<1x384xf32, #tpu.memory_space<vmem>>, vector<1x384xf32>
    %c0_1 = arith.constant 0 : index
    %c0_2 = arith.constant 0 : index
    %1 = vector.load %arg3[%c0_1, %c0_2] : memref<2x384xf32, #tpu.memory_space<vmem>>, vector<2x384xf32>
    %2 = vector.broadcast %0 : vector<1x384xf32> to vector<2x384xf32>
    %3 = arith.addf %1, %2 : vector<2x384xf32>
    %c0_3 = arith.constant 0 : index
    %c0_4 = arith.constant 0 : index
    %4 = vector.load %arg4[%c0_3, %c0_4] : memref<2x384xf32, #tpu.memory_space<vmem>>, vector<2x384xf32>
    tpu.vector_store %arg4[%c0_3, %c0_4], %3 {strides = array<i32>} : memref<2x384xf32, #tpu.memory_space<vmem>>, vector<2x384xf32>,
    return
  }
  func.func @transform_0(%arg0: i32, %arg1: i32) -> (i32, i32) {
    %c0_i32 = arith.constant 0 : i32
    %c0_i32_0 = arith.constant 0 : i32
    return %c0_i32, %arg0 : i32, i32
  }
  func.func @transform_1(%arg0: i32, %arg1: i32) -> (i32, i32) {
    %c0_i32 = arith.constant 0 : i32
    return %arg1, %arg0 : i32, i32
  }
  func.func @transform_2(%arg0: i32, %arg1: i32) -> (i32, i32) {
    %c0_i32 = arith.constant 0 : i32
    return %arg1, %arg0 : i32, i32
  }
}

</mosaic_0001>

<bundles_post_ra>
// kernel: tpu_custom_call.1
= control target key start
LH: loop header
LB: loop body
LE: loop exit
PB: predicated region body
PF: predicated region fallthrough
CT: control target
= control target key end

     0   :  { %7 = vsyncpa [#allocation3], 0  ;;  %s181_s0 = inlined_call_operand.hbm [shape: f32[1,384], index: 0, kind: input, shape index: {}]   ;;  %s182_s1 = inlined_call_operand.hbm [shape: f32[2,384], index: 1, kind: input, shape index: {}]   ;;  %s183_s2 = inlined_call_operand.hbm [shape: f32[2,384], index: 2, kind: output, shape index: {}]  }
   0x1   :  { %8 = vsyncpa [#allocation6], 0 }
   0x2   :  { %9 = vsyncpa [#allocation4], 0  ;;  %s15_s11 = sshll.u32 %s181_s0, 4  ;;  %s154_s12 = smov [#allocation2]   ;;  %s16_s11 = int_to_ptr.hbm [resolvable:$true] %s15_s11 }
   0x3   :  { %s17_s13 = sshll.u32 %s154_s12, 4  ;;  %s26_s16 = sshll.u32 %s182_s1, 4  ;;  %s18_s13 = int_to_ptr.vmem [resolvable:$true] %s17_s13  ;;  %s27_s16 = int_to_ptr.hbm [resolvable:$true] %s26_s16 }
   0x4   :  { %20 = dma.hbm_to_vmem [thread:$0]  %s16_s11, 48, %s18_s13, [#allocation3]  }
   0x5   :  { %s155_s17 = smov [#allocation5]  }
   0x6   :  { %s28_s18 = sshll.u32 %s155_s17, 4  ;;  %s29_s18 = int_to_ptr.vmem [resolvable:$true] %s28_s18 }
   0x7   :  { %31 = dma.hbm_to_vmem [thread:$0]  %s27_s16, 96, %s29_s18, [#allocation6]  }
   0x8   :  { %148 = dma.done.wait [#allocation3], 48  }
   0x9   :  { %149 = vsyncadd [#allocation3], 4294967248 }
   0xa   :  { %150 = dma.done.wait [#allocation6], 96  }
   0xb   :  { %151 = vsyncadd [#allocation6], 4294967200  ;;  %v40_v0 = vld [vmem:[#allocation2] sm:$0x7]  ;;  %vm48_vm0 = vcmask 1041408   ;;  %vm50_vm1 = vcmask 1043456  }
   0xc   :  { %v43_v1 = vperm.slane %v40_v0, 0  ;;  %v44_v2 = vperm.slane %v40_v0, 1  ;;  %v45_v3 = vperm.slane %v40_v0, 2  ;;  %v41_v6 = vld [vmem:[#allocation5] sm:$0x3f]  ;;  %s156_s0 = smov [#allocation7]  }
   0xd   :  { %s60_s1 = sshll.u32 %s156_s0, 4  ;;  %s62_s21 = sshll.u32 %s183_s2, 4  ;;  %s61_s1 = int_to_ptr.vmem [resolvable:$true] %s60_s1  ;;  %s63_s21 = int_to_ptr.hbm [resolvable:$true] %s62_s21 }
   0xe   :  { %v46_v4 = vrot.slane %v44_v2, 6  ;;  %v47_v5 = vrot.slane %v45_v3, 4 }
  0x10   :  { %v49_v7 = vsel %vm48_vm0, %v43_v1, %v46_v4 }
  0x11   :  { %v51_v8 = vsel %vm50_vm1, %v49_v7, %v47_v5 }
  0x12   :  { %v53_v9 = vadd.f32 %v51_v8, %v41_v6 }
  0x14   :  { %54 = vst [vmem:[#allocation7] sm:$0x3f] %v53_v9 }
  0x15   :  { %65 = dma.vmem_to_hbm [thread:$0]  %s61_s1, 96, %s63_s21, [#allocation4]  }
  0x16   :  { %152 = dma.done.wait [#allocation4], 96  }
  0x17   :  { %153 = vsyncadd [#allocation4], 4294967200 }
  0x18   :  { %70 = vsyncpa [#allocation3], 1 }
  0x19   :  { %71 = vsyncpa [#allocation6], 1 }
  0x1a   :  { %72 = vsyncpa [#allocation4], 1 }

</bundles_post_ra>
